<compile_context>
chip_gen: v5e
topology: v5e:2x2
jax: 0.10.0
libtpu: 0.0.40
codegen_flags: <defaults>
</compile_context>

<pallas_src>
import functools

import jax
import jax.numpy as jnp
from jax.experimental import pallas as pl
from jax.experimental.pallas import tpu as pltpu


def _round_up(v, m):
    return ((v + m - 1) // m) * m


def _center_loss_kernel(x_ref, labels_ref, c_ref, out_ref, acc_ref, *,
                        batch_size, num_classes, tile_rows, tiles_per_split):
    # x_ref:      (TB, D)  feature tile
    # labels_ref: (TB, 1)  int32 labels for this tile
    # c_ref:      (C, D)   full centers table, VMEM-resident across the grid
    # out_ref:    (8, 128) per-split partial-sum block (value broadcast)
    # acc_ref:    (1, 1)   f32 scratch accumulator
    o = pl.program_id(0)   # split ("parallel")
    i = pl.program_id(1)   # tile within split ("arbitrary", carries accumulator)

    @pl.when(i == 0)
    def _init():
        acc_ref[...] = jnp.zeros_like(acc_ref)

    x = x_ref[...].astype(jnp.float32)            # (TB, D)
    labels_tile = labels_ref[...]                 # (TB, 1) int32
    centers = c_ref[...].astype(jnp.float32)      # (C, D)

    # Gather centers[labels] via one-hot @ centers on the MXU (no dynamic gather,
    # no OOB access possible).
    class_ids = jax.lax.broadcasted_iota(jnp.int32, (tile_rows, num_classes), 1)
    one_hot = (class_ids == labels_tile).astype(jnp.float32)          # (TB, C)
    own_centers = jnp.dot(one_hot, centers,
                          preferred_element_type=jnp.float32)         # (TB, D)

    diff = x - own_centers
    d = jnp.sum(diff * diff, axis=-1, keepdims=True)                  # (TB, 1)
    d = jnp.clip(d, 1e-12, 1e12)

    # Zero out rows beyond the true batch (batch padding added by the wrapper).
    row_ids = ((o * tiles_per_split + i) * tile_rows
               + jax.lax.broadcasted_iota(jnp.int32, (tile_rows, 1), 0))
    d = jnp.where(row_ids < batch_size, d, jnp.float32(0.0))

    acc_ref[...] += jnp.sum(d, axis=(0, 1), keepdims=True)

    @pl.when(i == pl.num_programs(1) - 1)
    def _finalize():
        out_ref[...] = jnp.broadcast_to(acc_ref[...], out_ref.shape)


def center_loss(x, centers, labels, *, tile_rows=None, num_splits=None):
    """x: (B, D) float, centers: (C, D) float, labels: (B,) int -> scalar f32."""
    B, D = x.shape
    C, Dc = centers.shape
    assert D == Dc, (D, Dc)

    labels_2d = labels.astype(jnp.int32).reshape(B, 1)

    # Tile size: big enough to amortize per-step overhead, multiple of 16 rows.
    if tile_rows is None:
        tile_rows = min(512, _round_up(B, 16))
    tile_rows = _round_up(max(int(tile_rows), 16), 16)

    num_tiles = pl.cdiv(B, tile_rows)
    if num_splits is None:
        num_splits = 2 if num_tiles >= 2 else 1   # 2 TCs on v7x; no-op on v5e/v6e
    num_splits = max(1, min(int(num_splits), num_tiles))
    tiles_per_split = pl.cdiv(num_tiles, num_splits)
    b_pad = num_splits * tiles_per_split * tile_rows

    if b_pad != B:
        x = jnp.pad(x, ((0, b_pad - B), (0, 0)))
        labels_2d = jnp.pad(labels_2d, ((0, b_pad - B), (0, 0)))

    x_bytes = jnp.dtype(x.dtype).itemsize
    c_bytes = jnp.dtype(centers.dtype).itemsize

    # Explicit scoped-VMEM budget: double-buffered x/labels tiles + resident
    # centers (conservatively 2x) + output block + scratch, with headroom.
    vmem_needed = (2 * tile_rows * D * x_bytes
                   + 2 * tile_rows * 4
                   + 2 * C * D * c_bytes
                   + 2 * 8 * 128 * 4
                   + 4)
    vmem_limit = int(min(max(int(vmem_needed * 1.5) + (4 << 20), 32 << 20),
                         100 << 20))

    cost = pl.CostEstimate(
        flops=2 * b_pad * C * D + 3 * b_pad * D,
        transcendentals=0,
        bytes_accessed=(b_pad * D * x_bytes + C * D * c_bytes
                        + b_pad * 4 + num_splits * 8 * 128 * 4),
    )

    kernel = functools.partial(
        _center_loss_kernel,
        batch_size=B, num_classes=C,
        tile_rows=tile_rows, tiles_per_split=tiles_per_split)

    out = pl.pallas_call(
        kernel,
        out_shape=jax.ShapeDtypeStruct((num_splits * 8, 128), jnp.float32),
        grid_spec=pltpu.PrefetchScalarGridSpec(
            num_scalar_prefetch=0,
            grid=(num_splits, tiles_per_split),
            in_specs=[
                # x tile (streamed, double-buffered by the BlockSpec pipeline)
                pl.BlockSpec((tile_rows, D),
                             lambda o, i: (o * tiles_per_split + i, 0)),
                # labels tile
                pl.BlockSpec((tile_rows, 1),
                             lambda o, i: (o * tiles_per_split + i, 0)),
                # full centers table, resident in VMEM across the whole grid
                pl.BlockSpec((C, D), lambda o, i: (0, 0)),
            ],
            # One lane-dense (8, 128) partial-sum block per split.
            out_specs=pl.BlockSpec((8, 128), lambda o, i: (o, 0)),
            scratch_shapes=[pltpu.VMEM((1, 1), jnp.float32)],
        ),
        compiler_params=pltpu.CompilerParams(
            dimension_semantics=("parallel", "arbitrary"),
            vmem_limit_bytes=vmem_limit,
        ),
        cost_estimate=cost,
    )(x, labels_2d, centers)

    partials = out[::8, 0]                         # (num_splits,)
    masked_const = jnp.float32(B * (C - 1) * 1e-12)
    return (jnp.sum(partials) + masked_const) / jnp.float32(B)


def _reference_center_loss(x, centers, labels):
    """Pure-JAX mirror of the PyTorch module (expanded distmat + mask + clamp)."""
    B = x.shape[0]
    C = centers.shape[0]
    distmat = (jnp.sum(x * x, axis=1, keepdims=True)
               + jnp.sum(centers * centers, axis=1)[None, :]
               - 2.0 * x @ centers.T)
    mask = (labels[:, None] == jnp.arange(C)[None, :]).astype(jnp.float32)
    dist = jnp.clip(distmat * mask, 1e-12, 1e12)
    return jnp.sum(dist) / B


if __name__ == "__main__":
    # Small shapes consistent with the module: num_classes=16, feat_dim=32, batch=8
    num_classes = 16
    feat_dim = 32
    batch = 8

    key = jax.random.PRNGKey(0)
    k_x, k_c, k_l = jax.random.split(key, 3)

    x = jax.random.normal(k_x, (batch, feat_dim), dtype=jnp.float32)
    centers = jax.random.normal(k_c, (num_classes, feat_dim), dtype=jnp.float32)
    labels = jax.random.randint(k_l, (batch,), 0, num_classes, dtype=jnp.int32)

    loss = jax.block_until_ready(center_loss(x, centers, labels))

    ref = _reference_center_loss(x, centers, labels)
    assert jnp.allclose(loss, ref, rtol=1e-4, atol=1e-4), (loss, ref)

    print("KERNEL_OK")
</pallas_src>

<mosaic_0001>
module attributes {stable_mosaic.version = 11 : i64} {
  func.func @_center_loss_kernel(%arg0: i32, %arg1: i32, %arg2: memref<16x32xf32, #tpu.memory_space<vmem>>, %arg3: memref<16x1xi32, #tpu.memory_space<vmem>>, %arg4: memref<16x32xf32, #tpu.memory_space<vmem>>, %arg5: memref<8x128xf32, #tpu.memory_space<vmem>>, %arg6: memref<1x1xf32, #tpu.memory_space<vmem>>) attributes {dimension_semantics = [#tpu.dimension_semantics<parallel>, #tpu.dimension_semantics<arbitrary>], iteration_bounds = array<i64: 1, 1>, scalar_prefetch = 0 : i64, scratch_operands = 1 : i64, tpu.core_type = #tpu.core_type<tc>, window_params = [{transform_indices = @transform_0, window_bounds = array<i64: 16, 32>}, {transform_indices = @transform_1, window_bounds = array<i64: 16, 1>}, {pipeline_mode = #tpu.pipeline_mode<synchronous>, transform_indices = @transform_2, window_bounds = array<i64: 16, 32>}, {transform_indices = @transform_3, window_bounds = array<i64: 8, 128>}]} {
    %c0_i32 = arith.constant 0 : i32
    %0 = arith.cmpi eq, %arg1, %c0_i32 : i32
    %1 = arith.extui %0 : i1 to i32
    %c0_i32_0 = arith.constant 0 : i32
    %2 = arith.cmpi ne, %1, %c0_i32_0 : i32
    scf.if %2 {
      %cst_17 = arith.constant 0.000000e+00 : f32
      %41 = vector.broadcast %cst_17 : f32 to vector<1x1xf32>
      %c0_18 = arith.constant 0 : index
      %c0_19 = arith.constant 0 : index
      %42 = vector.load %arg6[%c0_18, %c0_19] : memref<1x1xf32, #tpu.memory_space<vmem>>, vector<1x1xf32>
      tpu.vector_store %arg6[%c0_18, %c0_19], %41 {strides = array<i32>} : memref<1x1xf32, #tpu.memory_space<vmem>>, vector<1x1xf32>,
    } else {
    }
    %c0 = arith.constant 0 : index
    %c0_1 = arith.constant 0 : index
    %3 = vector.load %arg2[%c0, %c0_1] : memref<16x32xf32, #tpu.memory_space<vmem>>, vector<16x32xf32>
    %c0_2 = arith.constant 0 : index
    %c0_3 = arith.constant 0 : index
    %4 = vector.load %arg3[%c0_2, %c0_3] : memref<16x1xi32, #tpu.memory_space<vmem>>, vector<16x1xi32>
    %c0_4 = arith.constant 0 : index
    %c0_5 = arith.constant 0 : index
    %5 = vector.load %arg4[%c0_4, %c0_5] : memref<16x32xf32, #tpu.memory_space<vmem>>, vector<16x32xf32>
    %6 = tpu.iota {dimensions = array<i32: 1>} : vector<16x16xi32>
    %7 = vector.broadcast %4 : vector<16x1xi32> to vector<16x16xi32>
    %8 = arith.cmpi eq, %6, %7 : vector<16x16xi32>
    %9 = arith.extui %8 : vector<16x16xi1> to vector<16x16xi32>
    %10 = arith.sitofp %9 : vector<16x16xi32> to vector<16x16xf32>
    %cst = arith.constant dense<0.000000e+00> : vector<16x32xf32>
    %11 = tpu.matmul %10, %5, %cst {dimension_numbers = #tpu.dot_dimension_numbers<[1], [0], [0], [1], [0, 0, 1, 1], [], []>} : vector<16x16xf32>, vector<16x32xf32>, vector<16x32xf32> -> vector<16x32xf32>
    %12 = arith.subf %3, %11 : vector<16x32xf32>
    %13 = arith.mulf %12, %12 : vector<16x32xf32>
    %cst_6 = arith.constant dense<0.000000e+00> : vector<16xf32>
    %14 = vector.multi_reduction <add>, %13, %cst_6 [1] : vector<16x32xf32> to vector<16xf32>
    %15 = vector.shape_cast %14 : vector<16xf32> to vector<16x1xf32>
    %cst_7 = arith.constant 9.99999996E-13 : f32
    %cst_8 = arith.constant 9.99999995E+11 : f32
    %16 = vector.broadcast %cst_7 : f32 to vector<16x1xf32>
    %17 = arith.maximumf %16, %15 : vector<16x1xf32>
    %18 = vector.broadcast %cst_8 : f32 to vector<16x1xf32>
    %19 = arith.minimumf %18, %17 : vector<16x1xf32>
    %c1_i32 = arith.constant 1 : i32
    %20 = arith.muli %arg0, %c1_i32 : i32
    %21 = arith.addi %20, %arg1 : i32
    %c16_i32 = arith.constant 16 : i32
    %22 = arith.muli %21, %c16_i32 : i32
    %23 = tpu.iota {dimensions = array<i32: 0>} : vector<16x1xi32>
    %24 = vector.broadcast %22 : i32 to vector<16x1xi32>
    %25 = arith.addi %24, %23 : vector<16x1xi32>
    %c8_i32 = arith.constant 8 : i32
    %26 = vector.broadcast %c8_i32 : i32 to vector<16x1xi32>
    %27 = arith.cmpi slt, %25, %26 : vector<16x1xi32>
    %cst_9 = arith.constant 0.000000e+00 : f32
    %28 = vector.broadcast %cst_9 : f32 to vector<16x1xf32>
    %29 = arith.select %27, %19, %28 : vector<16x1xi1>, vector<16x1xf32>
    %c0_10 = arith.constant 0 : index
    %c0_11 = arith.constant 0 : index
    %30 = vector.load %arg6[%c0_10, %c0_11] : memref<1x1xf32, #tpu.memory_space<vmem>>, vector<1x1xf32>
    %31 = vector.shape_cast %29 : vector<16x1xf32> to vector<1x16x1xf32>
    %cst_12 = arith.constant dense<0.000000e+00> : vector<1xf32>
    %32 = vector.multi_reduction <add>, %31, %cst_12 [1, 2] : vector<1x16x1xf32> to vector<1xf32>
    %33 = vector.shape_cast %32 : vector<1xf32> to vector<1x1x1xf32>
    %34 = vector.extract %33[0, 0, 0] : f32 from vector<1x1x1xf32>
    %35 = vector.broadcast %34 : f32 to vector<1x1xf32>
    %36 = arith.addf %30, %35 : vector<1x1xf32>
    %c0_13 = arith.constant 0 : index
    %c0_14 = arith.constant 0 : index
    %37 = vector.load %arg6[%c0_13, %c0_14] : memref<1x1xf32, #tpu.memory_space<vmem>>, vector<1x1xf32>
    tpu.vector_store %arg6[%c0_13, %c0_14], %36 {strides = array<i32>} : memref<1x1xf32, #tpu.memory_space<vmem>>, vector<1x1xf32>,
    %c0_i32_15 = arith.constant 0 : i32
    %38 = arith.cmpi eq, %arg1, %c0_i32_15 : i32
    %39 = arith.extui %38 : i1 to i32
    %c0_i32_16 = arith.constant 0 : i32
    %40 = arith.cmpi ne, %39, %c0_i32_16 : i32
    scf.if %40 {
      %c0_17 = arith.constant 0 : index
      %c0_18 = arith.constant 0 : index
      %41 = vector.load %arg6[%c0_17, %c0_18] : memref<1x1xf32, #tpu.memory_space<vmem>>, vector<1x1xf32>
      %42 = vector.shape_cast %41 : vector<1x1xf32> to vector<1x1xf32>
      %43 = vector.broadcast %42 : vector<1x1xf32> to vector<8x128xf32>
      %c0_19 = arith.constant 0 : index
      %c0_20 = arith.constant 0 : index
      %44 = vector.load %arg5[%c0_19, %c0_20] : memref<8x128xf32, #tpu.memory_space<vmem>>, vector<8x128xf32>
      tpu.vector_store %arg5[%c0_19, %c0_20], %43 {strides = array<i32>} : memref<8x128xf32, #tpu.memory_space<vmem>>, vector<8x128xf32>,
    } else {
    }
    return
  }
  func.func @transform_0(%arg0: i32, %arg1: i32) -> (i32, i32) {
    %c1_i32 = arith.constant 1 : i32
    %0 = arith.muli %arg0, %c1_i32 : i32
    %1 = arith.addi %0, %arg1 : i32
    %c0_i32 = arith.constant 0 : i32
    %c0_i32_0 = arith.constant 0 : i32
    return %1, %c0_i32 : i32, i32
  }
  func.func @transform_1(%arg0: i32, %arg1: i32) -> (i32, i32) {
    %c1_i32 = arith.constant 1 : i32
    %0 = arith.muli %arg0, %c1_i32 : i32
    %1 = arith.addi %0, %arg1 : i32
    %c0_i32 = arith.constant 0 : i32
    %c0_i32_0 = arith.constant 0 : i32
    return %1, %c0_i32 : i32, i32
  }
  func.func @transform_2(%arg0: i32, %arg1: i32) -> (i32, i32) {
    %c0_i32 = arith.constant 0 : i32
    %c0_i32_0 = arith.constant 0 : i32
    %c0_i32_1 = arith.constant 0 : i32
    return %c0_i32, %c0_i32_0 : i32, i32
  }
  func.func @transform_3(%arg0: i32, %arg1: i32) -> (i32, i32) {
    %c0_i32 = arith.constant 0 : i32
    %c0_i32_0 = arith.constant 0 : i32
    return %arg0, %c0_i32 : i32, i32
  }
}

</mosaic_0001>

<bundles_post_ra>
// kernel: tpu_custom_call.1
= control target key start
LH: loop header
LB: loop body
LE: loop exit
PB: predicated region body
PF: predicated region fallthrough
CT: control target
= control target key end

     0   :  { %8 = vsyncpa [#allocation4], 0  ;;  %s331_s0 = inlined_call_operand.vmem [shape: f32[16,32], index: 0, kind: input, shape index: {}]   ;;  %s332_s1 = inlined_call_operand.vmem [shape: s32[16,1], index: 1, kind: input, shape index: {}]   ;;  %s333_s2 = inlined_call_operand.hbm [shape: f32[16,32], index: 2, kind: input, shape index: {}]   ;;  %s334_s3 = inlined_call_operand.hbm [shape: f32[8,128], index: 3, kind: output, shape index: {}]  }
   0x1   :  { %9 = vsyncpa [#allocation5], 0  ;;  %s34_s14 = sshll.u32 %s333_s2, 4  ;;  %s286_s15 = smov [#allocation3]   ;;  %s35_s14 = int_to_ptr.hbm [resolvable:$true] %s34_s14 }
   0x2   :  { %s36_s16 = sshll.u32 %s286_s15, 4  ;;  %s287_s17 = smov 128   ;;  %s37_s16 = int_to_ptr.vmem [resolvable:$true] %s36_s16 }
   0x3   :  { %s288_s18 = smov 8  }
   0x4   :  { %42 = dma.hbm_to_vmem [thread:$0]  %s35_s14, 256, %s37_s16, [#allocation4], %s287_s17, %s287_s17, %s288_s18  }
   0x5   :  { %282 = dma.done.wait [#allocation4], 256  }
   0x6   :  { %283 = vsyncadd [#allocation4], 4294967040  ;;  %vm79_vm0 = vcmask 0   ;;  %v289_v0 = vmov 0   ;;  %v290_v1 = vmov 0.0   ;;  %v83_v2 = vld [vmem:[%s332_s1] sm:$0xff]  ;;  %v87_v5 = vlaneseq }
   0x7   :  { %230 = vset.pattern.permute.xlu0 %v289_v0  ;;  %80 = vst.msk [vmem:[#allocation2] sm:$0x1] %vm79_vm0, %v290_v1  ;;  %231 = vset.pattern.permute.xlu1 %v289_v0  ;;  %v86_v3 = vld [vmem:[#allocation3 + $0x8] sm:$0xff]  ;;  %v85_v4 = vld [vmem:[#allocation3] sm:$0xff]  ;;  %vm101_vm1 = vcmask 130048   ;;  %vm135_vm3 = vcmask 261120  }
   0x8   :  { %232 = vset.pattern.permute.xlu2 %v289_v0  ;;  %90 = vperm.xlu0 %230, %v83_v2   ;;  %v88_v6 = vand.u32 127, %v87_v5  ;;  %v84_v9 = vld [vmem:[%s332_s1 + $0x8] sm:$0xff]  ;;  %v81_v10 = vld [vmem:[%s331_s0] sm:$0xff]  ;;  %vm159_vm5 = vcmask 7168   ;;  %s291_s1 = smov [#allocation6]   ;;  %s194_s27 = sshll.u32 %s334_s3, 4  ;;  %s195_s27 = int_to_ptr.hbm [resolvable:$true] %s194_s27 }
   0x9   :  { %122 = vmatpush.msra.mxu0 %v86_v3  ;;  %220 = vmatpush.msra.mxu1 %v86_v3  ;;  %s192_s24 = sshll.u32 %s291_s1, 4  ;;  %s193_s24 = int_to_ptr.vmem [resolvable:$true] %s192_s24 }
   0xa   :  { %93 = vperm.xlu1 %231, %v84_v9  }
   0xb   :  { %123 = vmatpush.msra.mxu0 %v85_v4  ;;  %221 = vmatpush.msra.mxu1 %v85_v4 }
   0xe   :  { %v158_v29 = vld [vmem:[#allocation2] sm:$0x1] }
  0x7a   :  { %v91_v7 = vpop.permute.xlu0 %90 }
  0x7b   :  { %vm95_vm2 = vcmp.eq.s32.totalorder %v88_v6, %v91_v7 }
  0x7c   :  { %v216_v8 = vsel %vm95_vm2, 1.0, %v290_v1  ;;  %v94_v15 = vpop.permute.xlu1 %93 }
  0x7d   :  { %218 = vmatmul.msk.f32.vlgmr.msra.gmra.mxu0 %vm101_vm1, %v216_v8  ;;  %vm96_vm4 = vcmp.eq.s32.totalorder %v88_v6, %v94_v15 }
  0x7e   :  { %v217_v16 = vsel %vm96_vm4, 1.0, %v290_v1 }
  0x7f   :  { %219 = vmatmul.msk.f32.vlgmr.msra.gmra.mxu1 %vm101_vm1, %v217_v16 }
  0xfa   :  { %v125_v11 = vpop.f32.mrf.mxu0 }
  0xfb   :  { %v131_v12 = vsub.f32 %v81_v10, %v125_v11 }
  0xfc   :  { %v128_v21 = vpop.f32.mrf.mxu1 }
  0xfd   :  { %v133_v13 = vmul.f32 %v131_v12, %v131_v12 }
  0xff   :  { %v136_v14 = vsel %vm135_vm3, %v133_v13, 0.0 }
 0x100   :  { %137 = vadd.xlane.f32.xlu0 %v136_v14 }
 0x173   :  { %v138_v17 = vpop.xlane.xlu0 %137 }
 0x174   :  { %v142_v18 = vmax.f32 %v138_v17, 1e-12 }
 0x176   :  { %v144_v19 = vmin.f32 %v142_v18, 1e+12 }
 0x178   :  { %v160_v20 = vsel %vm159_vm5, %v144_v19, 0.0 }
 0x179   :  { %163 = vadd.xlane.f32.xlu1 %v160_v20 }
 0x1ec   :  { %v164_v22 = vpop.xlane.xlu1 %163 }
 0x1ed   :  { %v165_v23 = vrot.slane %v164_v22, 4 }
 0x1ef   :  { %v166_v24 = vadd.f32 %v165_v23, %v164_v22 }
 0x1f1   :  { %v167_v25 = vrot.slane %v166_v24, 2 }
 0x1f3   :  { %v168_v26 = vadd.f32 %v167_v25, %v166_v24 }
 0x1f5   :  { %v169_v27 = vrot.slane %v168_v26, 1 }
 0x1f7   :  { %v170_v28 = vadd.f32 %v169_v27, %v168_v26 }
 0x1f9   :  { %222 = vpush %v170_v28 }
 0x22a   :  { %s223_s0 = spop %222 }
 0x22b   :  { %v172_v30 = vstv %s223_s0 }
 0x22c   :  { %v173_v31 = vadd.f32 %v172_v30, %v158_v29 }
 0x22e   :  { %175 = vst.msk [vmem:[#allocation2] sm:$0x1] %vm79_vm0, %v173_v31 }
 0x235   :  { %v233_v32 = vld [vmem:[#allocation2] ss:$0 sm:$0xff] }
 0x236   :  { %183 = vperm.xlu2 %232, %v233_v32  }
 0x290   :  { %v184_v33 = vpop.permute.xlu2 %183 }
 0x291   :  { %186 = vst [vmem:[#allocation6] sm:$0xff] %v184_v33 }
 0x292   :  { %197 = dma.vmem_to_hbm [thread:$0]  %s193_s24, 128, %s195_s27, [#allocation5]  }
 0x293   :  { %284 = dma.done.wait [#allocation5], 128  }
 0x294   :  { %285 = vsyncadd [#allocation5], 4294967168 }
 0x295   :  { %202 = vsyncpa [#allocation4], 1 }
 0x296   :  { %203 = vsyncpa [#allocation5], 1 }

</bundles_post_ra>
